<compile_context>
chip_gen: v5e
topology: v5e:2x2
jax: 0.10.0
libtpu: 0.0.40
codegen_flags: <defaults>
</compile_context>

<pallas_src>
import jax
import jax.numpy as jnp
from jax.experimental import pallas as pl
from jax.experimental.pallas import tpu as pltpu


# ----------------------------- kernel ---------------------------------------
def make_specific_vnet_kernel(obs_pad: int, d: int, w_dtype):
    """Kernel factory; obs_pad / d / w_dtype are compile-time constants.

    Packed weight buffer W_all (rows, 2d), row blocks (offsets are multiples of 8):
      [0         , obs_pad )  [e_w1 | e_ws]   encoder fused (obs_pad, 2d)
      [obs_pad   , +d      )  e_w2            (d, d) in cols [0:d]
      [..        , +d      )  [m_w1 | m_ws]   shared_mlp fused (d, 2d)
      [..        , +d      )  m_w2            (d, d) in cols [0:d]
      [..        , +d      )  d_w1            (d, d) in cols [0:d]

    Packed bias buffer b_all (1, 8d), f32, column blocks:
      [0:d]   e_b1
      [d:2d]  e_b2 + e_bs
      [2d:3d] m_b1 + te @ m_w1           (task embedding folded in)
      [3d:4d] m_b2 + m_bs + te @ m_ws    (task embedding folded in)
      [4d:5d] d_b1
      [5d:6d] d_w2 column as a row       (value head done on the VPU)
      [6d:7d] d_ws column as a row
      [7d]    d_b2 + d_bs (scalar)
    """
    r_e2 = obs_pad
    r_mid = r_e2 + d
    r_m2 = r_mid + d
    r_d1 = r_m2 + d
    r_end = r_d1 + d
    f32 = jnp.float32

    def kernel(x_ref, w_ref, b_ref, out_ref):
        x = x_ref[...]                                   # (TB, obs_pad), matmul dtype

        b_e1 = b_ref[:, 0 * d:1 * d]
        b_e_out = b_ref[:, 1 * d:2 * d]
        b_m1 = b_ref[:, 2 * d:3 * d]
        b_m_out = b_ref[:, 3 * d:4 * d]
        d_b1 = b_ref[:, 4 * d:5 * d]
        w2_row = b_ref[:, 5 * d:6 * d]
        ws_row = b_ref[:, 6 * d:7 * d]
        c_out = b_ref[:, 7 * d:7 * d + 1]                # (1, 1)

        # Stage 1: obs encoder ResidualMLP, fused [W1 | Wskip] matmul.
        z = jnp.dot(x, w_ref[0:r_e2, :], preferred_element_type=f32)        # (TB, 2d)
        h = jnp.maximum(z[:, :d] + b_e1, 0.0)
        e_out = (jnp.dot(h.astype(w_dtype), w_ref[r_e2:r_mid, 0:d],
                         preferred_element_type=f32) + b_e_out + z[:, d:])
        h1 = jnp.maximum(e_out, 0.0)      # act(encoder(x)); task-embed add folded below

        # Stage 2: shared_mlp ResidualMLP (task embedding folded into b_m1 / b_m_out).
        z = jnp.dot(h1.astype(w_dtype), w_ref[r_mid:r_m2, :], preferred_element_type=f32)
        h = jnp.maximum(z[:, :d] + b_m1, 0.0)
        m_out = (jnp.dot(h.astype(w_dtype), w_ref[r_m2:r_d1, 0:d],
                         preferred_element_type=f32) + b_m_out + z[:, d:])
        h2 = jnp.maximum(m_out, 0.0)

        # Stage 3: value decoder ResidualMLP (d -> 1) without the N=1 MXU matmul:
        # the (d,1) output weights are broadcast rows; VPU multiply + one lane reduce.
        v_hid = jnp.maximum(
            jnp.dot(h2.astype(w_dtype), w_ref[r_d1:r_end, 0:d],
                    preferred_element_type=f32) + d_b1, 0.0)
        val = jnp.sum(v_hid * w2_row + h2 * ws_row, axis=-1, keepdims=True) + c_out
        out_ref[...] = val.astype(out_ref.dtype)

    return kernel


# ----------------------------- wrapper ---------------------------------------
def _pack_params(params, task_embed_row, obs_dim, d, matmul_dtype):
    (e_w1, e_b1, e_w2, e_b2, e_ws, e_bs,
     m_w1, m_b1, m_w2, m_b2, m_ws, m_bs,
     d_w1, d_b1, d_w2, d_b2, d_ws, d_bs) = params

    assert d % 8 == 0, "d_model must be a multiple of 8"
    obs_pad = ((obs_dim + 7) // 8) * 8

    def pad_to(a, rows, cols):
        return jnp.pad(a, ((0, rows - a.shape[0]), (0, cols - a.shape[1])))

    w_enc = pad_to(jnp.concatenate([e_w1, e_ws], axis=1), obs_pad, 2 * d)
    w_e2 = pad_to(e_w2, d, 2 * d)
    w_mid = jnp.concatenate([m_w1, m_ws], axis=1)                      # (d, 2d)
    w_m2 = pad_to(m_w2, d, 2 * d)
    w_d1p = pad_to(d_w1, d, 2 * d)
    w_all = jnp.concatenate([w_enc, w_e2, w_mid, w_m2, w_d1p],
                            axis=0).astype(matmul_dtype)

    te = task_embed_row.reshape(1, d).astype(jnp.float32)
    c = (d_b2 + d_bs).reshape(1, 1)
    b_all = jnp.concatenate(
        [e_b1.reshape(1, d),
         (e_b2 + e_bs).reshape(1, d),
         m_b1.reshape(1, d) + te @ m_w1,                 # task embedding fold
         (m_b2 + m_bs).reshape(1, d) + te @ m_ws,        # task embedding fold
         d_b1.reshape(1, d),
         d_w2.reshape(1, d),                             # (d,1) column -> row
         d_ws.reshape(1, d),
         jnp.pad(c, ((0, 0), (0, d - 1)))],
        axis=1).astype(jnp.float32)
    return w_all, b_all, obs_pad


def specific_vnet_forward(x, task_embed_row, params, *,
                          matmul_dtype=jnp.float32, batch_tile=256):
    """x: (B, obs_dim) f32, task_embed_row: (1, d_model) f32, params: 18 arrays."""
    B, obs_dim = x.shape
    d = task_embed_row.shape[-1]
    w_all, b_all, obs_pad = _pack_params(params, task_embed_row, obs_dim, d,
                                         matmul_dtype)

    x_p = x
    if obs_pad != obs_dim:
        x_p = jnp.pad(x_p, ((0, 0), (0, obs_pad - obs_dim)))
    x_p = x_p.astype(matmul_dtype)

    kernel = make_specific_vnet_kernel(obs_pad, d, matmul_dtype)
    vmem = pltpu.MemorySpace.VMEM

    if B <= batch_tile:
        # Tiny batch: single invocation, everything resident in VMEM, 3 inputs.
        return pl.pallas_call(
            kernel,
            out_shape=jax.ShapeDtypeStruct((B, 1), jnp.float32),
            in_specs=[pl.BlockSpec(memory_space=vmem)] * 3,
            out_specs=pl.BlockSpec(memory_space=vmem),
        )(x_p, w_all, b_all)

    # Large batch: grid over batch; weights/biases stay resident (constant block),
    # batch axis marked parallel so v7x shards it across its two TensorCores.
    tb = batch_tile
    Bp = ((B + tb - 1) // tb) * tb
    if Bp != B:
        x_p = jnp.pad(x_p, ((0, Bp - B), (0, 0)))
    out = pl.pallas_call(
        kernel,
        out_shape=jax.ShapeDtypeStruct((Bp, 1), jnp.float32),
        grid=(Bp // tb,),
        in_specs=[
            pl.BlockSpec((tb, obs_pad), lambda i: (i, 0)),
            pl.BlockSpec(w_all.shape, lambda i: (0, 0)),
            pl.BlockSpec(b_all.shape, lambda i: (0, 0)),
        ],
        out_specs=pl.BlockSpec((tb, 1), lambda i: (i, 0)),
        compiler_params=pltpu.CompilerParams(dimension_semantics=("parallel",)),
    )(x_p, w_all, b_all)
    return out[:B]


# ---------------- pure-JAX reference (unfused, matches the PyTorch guess) ----
def _residual_mlp_ref(x, w1, b1, w2, b2, ws, bs):
    h = jnp.maximum(x @ w1 + b1, 0.0)
    return h @ w2 + b2 + (x @ ws + bs)


def reference_forward(x, task_embed_row, p):
    (e_w1, e_b1, e_w2, e_b2, e_ws, e_bs,
     m_w1, m_b1, m_w2, m_b2, m_ws, m_bs,
     d_w1, d_b1, d_w2, d_b2, d_ws, d_bs) = p
    h = jnp.maximum(_residual_mlp_ref(x, e_w1, e_b1, e_w2, e_b2, e_ws, e_bs), 0.0)
    h = h + task_embed_row
    h = jnp.maximum(_residual_mlp_ref(h, m_w1, m_b1, m_w2, m_b2, m_ws, m_bs), 0.0)
    return _residual_mlp_ref(h, d_w1, d_b1, d_w2, d_b2, d_ws, d_bs)


def _make_residual_mlp_params(key, in_dim, hidden, out_dim):
    k1, k2, k3 = jax.random.split(key, 3)
    scale = lambda dd: 1.0 / jnp.sqrt(jnp.float32(dd))
    w1 = jax.random.normal(k1, (in_dim, hidden), jnp.float32) * scale(in_dim)
    b1 = jnp.zeros((1, hidden), jnp.float32)
    w2 = jax.random.normal(k2, (hidden, out_dim), jnp.float32) * scale(hidden)
    b2 = jnp.zeros((1, out_dim), jnp.float32)
    ws = jax.random.normal(k3, (in_dim, out_dim), jnp.float32) * scale(in_dim)
    bs = jnp.zeros((1, out_dim), jnp.float32)
    return [w1, b1, w2, b2, ws, bs]


if __name__ == "__main__":
    B, OBS_DIM, D_MODEL = 8, 24, 32
    NUM_TASKS, TASK_ID = 3, 0

    key = jax.random.PRNGKey(0)
    kx, kenc, kmlp, kdec, kemb, kx2 = jax.random.split(key, 6)

    x = jax.random.normal(kx, (B, OBS_DIM), jnp.float32)

    task_embedding = jax.random.normal(kemb, (NUM_TASKS, D_MODEL), jnp.float32) * 0.1
    te_row = task_embedding[TASK_ID][None, :]                       # (1, d_model)

    params = (
        _make_residual_mlp_params(kenc, OBS_DIM, D_MODEL, D_MODEL)   # obs encoder
        + _make_residual_mlp_params(kmlp, D_MODEL, D_MODEL, D_MODEL) # shared_mlp
        + _make_residual_mlp_params(kdec, D_MODEL, D_MODEL, 1)       # value decoder
    )

    # --- small batch, f32 operands, single invocation ---
    value = specific_vnet_forward(x, te_row, params)
    value = jax.block_until_ready(value)
    ref = reference_forward(x, te_row, params)
    assert value.shape == (B, 1)
    assert jnp.allclose(value, ref, atol=1e-2, rtol=1e-2)

    # --- larger batch: bf16 matmul operands + batch grid (v6e / v7x path) ---
    B2 = 512
    x2 = jax.random.normal(kx2, (B2, OBS_DIM), jnp.float32)
    value2 = specific_vnet_forward(x2, te_row, params,
                                   matmul_dtype=jnp.bfloat16, batch_tile=256)
    value2 = jax.block_until_ready(value2)
    ref2 = reference_forward(x2, te_row, params)
    assert value2.shape == (B2, 1)
    assert jnp.allclose(value2, ref2, atol=1.5e-1, rtol=1.5e-1)

    print("KERNEL_OK")
</pallas_src>

<mosaic_0001>
module attributes {stable_mosaic.version = 11 : i64} {
  func.func @kernel(%arg0: memref<8x24xf32, #tpu.memory_space<vmem>>, %arg1: memref<152x64xf32, #tpu.memory_space<vmem>>, %arg2: memref<1x256xf32, #tpu.memory_space<vmem>>, %arg3: memref<8x1xf32, #tpu.memory_space<vmem>>) attributes {dimension_semantics = [], scalar_prefetch = 0 : i64, scratch_operands = 0 : i64, tpu.core_type = #tpu.core_type<tc>} {
    %c0 = arith.constant 0 : index
    %c0_0 = arith.constant 0 : index
    %0 = vector.load %arg0[%c0, %c0_0] : memref<8x24xf32, #tpu.memory_space<vmem>>, vector<8x24xf32>
    %c0_1 = arith.constant 0 : index
    %c0_2 = arith.constant 0 : index
    %1 = vector.load %arg2[%c0_1, %c0_2] : memref<1x256xf32, #tpu.memory_space<vmem>>, vector<1x32xf32>
    %c0_3 = arith.constant 0 : index
    %c32 = arith.constant 32 : index
    %2 = vector.load %arg2[%c0_3, %c32] : memref<1x256xf32, #tpu.memory_space<vmem>>, vector<1x32xf32>
    %c0_4 = arith.constant 0 : index
    %c64 = arith.constant 64 : index
    %3 = vector.load %arg2[%c0_4, %c64] : memref<1x256xf32, #tpu.memory_space<vmem>>, vector<1x32xf32>
    %c0_5 = arith.constant 0 : index
    %c96 = arith.constant 96 : index
    %4 = vector.load %arg2[%c0_5, %c96] : memref<1x256xf32, #tpu.memory_space<vmem>>, vector<1x32xf32>
    %c0_6 = arith.constant 0 : index
    %c128 = arith.constant 128 : index
    %5 = vector.load %arg2[%c0_6, %c128] : memref<1x256xf32, #tpu.memory_space<vmem>>, vector<1x32xf32>
    %c0_7 = arith.constant 0 : index
    %c160 = arith.constant 160 : index
    %6 = vector.load %arg2[%c0_7, %c160] : memref<1x256xf32, #tpu.memory_space<vmem>>, vector<1x32xf32>
    %c0_8 = arith.constant 0 : index
    %c192 = arith.constant 192 : index
    %7 = vector.load %arg2[%c0_8, %c192] : memref<1x256xf32, #tpu.memory_space<vmem>>, vector<1x32xf32>
    %c0_9 = arith.constant 0 : index
    %c224 = arith.constant 224 : index
    %8 = vector.load %arg2[%c0_9, %c224] : memref<1x256xf32, #tpu.memory_space<vmem>>, vector<1x1xf32>
    %c0_10 = arith.constant 0 : index
    %c0_11 = arith.constant 0 : index
    %9 = vector.load %arg1[%c0_10, %c0_11] : memref<152x64xf32, #tpu.memory_space<vmem>>, vector<24x64xf32>
    %cst = arith.constant dense<0.000000e+00> : vector<8x64xf32>
    %10 = tpu.matmul %0, %9, %cst {dimension_numbers = #tpu.dot_dimension_numbers<[1], [0], [0], [1], [0, 0, 1, 1], [], []>} : vector<8x24xf32>, vector<24x64xf32>, vector<8x64xf32> -> vector<8x64xf32>
    %11 = vector.extract_strided_slice %10 {offsets = [0, 0], sizes = [8, 32], strides = [1, 1]} : vector<8x64xf32> to vector<8x32xf32>
    %12 = vector.broadcast %1 : vector<1x32xf32> to vector<8x32xf32>
    %13 = arith.addf %11, %12 : vector<8x32xf32>
    %cst_12 = arith.constant 0.000000e+00 : f32
    %14 = vector.broadcast %cst_12 : f32 to vector<8x32xf32>
    %15 = arith.maximumf %13, %14 : vector<8x32xf32>
    %c24 = arith.constant 24 : index
    %c0_13 = arith.constant 0 : index
    %16 = vector.load %arg1[%c24, %c0_13] : memref<152x64xf32, #tpu.memory_space<vmem>>, vector<32x32xf32>
    %cst_14 = arith.constant dense<0.000000e+00> : vector<8x32xf32>
    %17 = tpu.matmul %15, %16, %cst_14 {dimension_numbers = #tpu.dot_dimension_numbers<[1], [0], [0], [1], [0, 0, 1, 1], [], []>} : vector<8x32xf32>, vector<32x32xf32>, vector<8x32xf32> -> vector<8x32xf32>
    %18 = vector.broadcast %2 : vector<1x32xf32> to vector<8x32xf32>
    %19 = arith.addf %17, %18 : vector<8x32xf32>
    %20 = vector.extract_strided_slice %10 {offsets = [0, 32], sizes = [8, 32], strides = [1, 1]} : vector<8x64xf32> to vector<8x32xf32>
    %21 = arith.addf %19, %20 : vector<8x32xf32>
    %cst_15 = arith.constant 0.000000e+00 : f32
    %22 = vector.broadcast %cst_15 : f32 to vector<8x32xf32>
    %23 = arith.maximumf %21, %22 : vector<8x32xf32>
    %c56 = arith.constant 56 : index
    %c0_16 = arith.constant 0 : index
    %24 = vector.load %arg1[%c56, %c0_16] : memref<152x64xf32, #tpu.memory_space<vmem>>, vector<32x64xf32>
    %cst_17 = arith.constant dense<0.000000e+00> : vector<8x64xf32>
    %25 = tpu.matmul %23, %24, %cst_17 {dimension_numbers = #tpu.dot_dimension_numbers<[1], [0], [0], [1], [0, 0, 1, 1], [], []>} : vector<8x32xf32>, vector<32x64xf32>, vector<8x64xf32> -> vector<8x64xf32>
    %26 = vector.extract_strided_slice %25 {offsets = [0, 0], sizes = [8, 32], strides = [1, 1]} : vector<8x64xf32> to vector<8x32xf32>
    %27 = vector.broadcast %3 : vector<1x32xf32> to vector<8x32xf32>
    %28 = arith.addf %26, %27 : vector<8x32xf32>
    %cst_18 = arith.constant 0.000000e+00 : f32
    %29 = vector.broadcast %cst_18 : f32 to vector<8x32xf32>
    %30 = arith.maximumf %28, %29 : vector<8x32xf32>
    %c88 = arith.constant 88 : index
    %c0_19 = arith.constant 0 : index
    %31 = vector.load %arg1[%c88, %c0_19] : memref<152x64xf32, #tpu.memory_space<vmem>>, vector<32x32xf32>
    %cst_20 = arith.constant dense<0.000000e+00> : vector<8x32xf32>
    %32 = tpu.matmul %30, %31, %cst_20 {dimension_numbers = #tpu.dot_dimension_numbers<[1], [0], [0], [1], [0, 0, 1, 1], [], []>} : vector<8x32xf32>, vector<32x32xf32>, vector<8x32xf32> -> vector<8x32xf32>
    %33 = vector.broadcast %4 : vector<1x32xf32> to vector<8x32xf32>
    %34 = arith.addf %32, %33 : vector<8x32xf32>
    %35 = vector.extract_strided_slice %25 {offsets = [0, 32], sizes = [8, 32], strides = [1, 1]} : vector<8x64xf32> to vector<8x32xf32>
    %36 = arith.addf %34, %35 : vector<8x32xf32>
    %cst_21 = arith.constant 0.000000e+00 : f32
    %37 = vector.broadcast %cst_21 : f32 to vector<8x32xf32>
    %38 = arith.maximumf %36, %37 : vector<8x32xf32>
    %c120 = arith.constant 120 : index
    %c0_22 = arith.constant 0 : index
    %39 = vector.load %arg1[%c120, %c0_22] : memref<152x64xf32, #tpu.memory_space<vmem>>, vector<32x32xf32>
    %cst_23 = arith.constant dense<0.000000e+00> : vector<8x32xf32>
    %40 = tpu.matmul %38, %39, %cst_23 {dimension_numbers = #tpu.dot_dimension_numbers<[1], [0], [0], [1], [0, 0, 1, 1], [], []>} : vector<8x32xf32>, vector<32x32xf32>, vector<8x32xf32> -> vector<8x32xf32>
    %41 = vector.broadcast %5 : vector<1x32xf32> to vector<8x32xf32>
    %42 = arith.addf %40, %41 : vector<8x32xf32>
    %cst_24 = arith.constant 0.000000e+00 : f32
    %43 = vector.broadcast %cst_24 : f32 to vector<8x32xf32>
    %44 = arith.maximumf %42, %43 : vector<8x32xf32>
    %45 = vector.broadcast %6 : vector<1x32xf32> to vector<8x32xf32>
    %46 = arith.mulf %44, %45 : vector<8x32xf32>
    %47 = vector.broadcast %7 : vector<1x32xf32> to vector<8x32xf32>
    %48 = arith.mulf %38, %47 : vector<8x32xf32>
    %49 = arith.addf %46, %48 : vector<8x32xf32>
    %cst_25 = arith.constant dense<0.000000e+00> : vector<8xf32>
    %50 = vector.multi_reduction <add>, %49, %cst_25 [1] : vector<8x32xf32> to vector<8xf32>
    %51 = vector.shape_cast %50 : vector<8xf32> to vector<8x1xf32>
    %52 = vector.broadcast %8 : vector<1x1xf32> to vector<8x1xf32>
    %53 = arith.addf %51, %52 : vector<8x1xf32>
    %c0_26 = arith.constant 0 : index
    %c0_27 = arith.constant 0 : index
    %54 = vector.load %arg3[%c0_26, %c0_27] : memref<8x1xf32, #tpu.memory_space<vmem>>, vector<8x1xf32>
    tpu.vector_store %arg3[%c0_26, %c0_27], %53 {strides = array<i32>} : memref<8x1xf32, #tpu.memory_space<vmem>>, vector<8x1xf32>,
    return
  }
}

</mosaic_0001>

<bundles_post_ra>
// kernel: tpu_custom_call.1
= control target key start
LH: loop header
LB: loop body
LE: loop exit
PB: predicated region body
PF: predicated region fallthrough
CT: control target
= control target key end

     0   :  { %vm20_vm0 = vcmask 195584   ;;  %s218_s24 = smov 96   ;;  %vm56_vm1 = vcmask 261120   ;;  %s220_s14 = smov 32   ;;  %vm202_vm2 = vcmask 7168   ;;  %s321_s1 = inlined_call_operand.vmem [shape: f32[152,64], index: 1, kind: input, shape index: {}]   ;;  %s322_s2 = inlined_call_operand.vmem [shape: f32[1,256], index: 2, kind: input, shape index: {}]   ;;  %s323_s0 = inlined_call_operand.vmem [shape: f32[8,24], index: 0, kind: input, shape index: {}]   ;;  %s324_s3 = inlined_call_operand.vmem [shape: f32[8,1], index: 3, kind: output, shape index: {}]  }
   0x1   :  { %v19_v0 = vld [vmem:[%s321_s1 + $0x10] sm:$0xff]  ;;  %v18_v1 = vld [vmem:[%s321_s1 + $0x8] sm:$0xff]  ;;  %v216_v2 = vld [vmem:[%s322_s2] ss:$0 sm:$0xff] }
   0x2   :  { %37 = vmatpush.msra.mxu0 %v19_v0  ;;  %v17_v3 = vld [vmem:[%s321_s1] sm:$0xff]  ;;  %v52_v4 = vld [vmem:[%s321_s1 + $0x30] sm:$0xff]  ;;  %53 = vrot.lane.b32.xlu0 %v216_v2, %s218_s24  ;;  %v51_v6 = vld [vmem:[%s321_s1 + $0x28] sm:$0xff] }
   0x3   :  { %v14_v5 = vld [vmem:[%s323_s0] sm:$0xff]  ;;  %72 = vmatpush.msra.mxu1 %v52_v4  ;;  %v49_v8 = vld [vmem:[%s321_s1 + $0x18] sm:$0xff]  ;;  %s219_s0 = smov 64   ;;  %v89_v12 = vld [vmem:[%s321_s1 + $0x50] sm:$0xff] }
   0x4   :  { %38 = vmatpush.msra.mxu0 %v18_v1  ;;  %v50_v7 = vld [vmem:[%s321_s1 + $0x20] sm:$0xff]  ;;  %113 = vrot.lane.b32.xlu1 %v216_v2, %s219_s0  ;;  %v88_v13 = vld [vmem:[%s321_s1 + $0x48] sm:$0xff]  ;;  %v86_v15 = vld [vmem:[%s321_s1 + $0x38] sm:$0xff] }
   0x5   :  { %73 = vmatpush.msra.mxu1 %v51_v6  ;;  %105 = vmatpush.msra.mxu2 %v89_v12  ;;  %v87_v14 = vld [vmem:[%s321_s1 + $0x40] sm:$0xff]  ;;  %v121_v16 = vld [vmem:[%s321_s1 + $0x70] sm:$0xff]  ;;  %v120_v23 = vld [vmem:[%s321_s1 + $0x68] sm:$0xff] }
   0x6   :  { %39 = vmatpush.msra.mxu0 %v17_v3  ;;  %140 = vmatpush.msra.mxu3 %v121_v16  ;;  %v119_v24 = vld [vmem:[%s321_s1 + $0x60] sm:$0xff]  ;;  %v118_v25 = vld [vmem:[%s321_s1 + $0x58] sm:$0xff]  ;;  %v157_v31 = vld [vmem:[%s321_s1 + $0x90] sm:$0xff] }
   0x7   :  { %208 = vmatmul.msk.f32.vlgmr.msra.gmra.mxu0 %vm20_vm0, %v14_v5  ;;  %74 = vmatpush.msra.mxu1 %v50_v7  ;;  %v217_v26 = vld [vmem:[%s322_s2 + $0x1] ss:$0 sm:$0xff]  ;;  %v156_v32 = vld [vmem:[%s321_s1 + $0x88] sm:$0xff]  ;;  %v154_v34 = vld [vmem:[%s321_s1 + $0x78] sm:$0xff] }
   0x8   :  { %106 = vmatpush.msra.mxu2 %v88_v13  ;;  %141 = vmatpush.msra.mxu3 %v120_v23  ;;  %v155_v33 = vld [vmem:[%s321_s1 + $0x80] sm:$0xff] }
   0x9   :  { %75 = vmatpush.msra.mxu1 %v49_v8  ;;  %176 = vmatpush.msrb.mxu0 %v157_v31 }
   0xa   :  { %107 = vmatpush.msra.mxu2 %v87_v14  ;;  %142 = vmatpush.msra.mxu3 %v119_v24 }
   0xb   :  { %177 = vmatpush.msrb.mxu0 %v156_v32 }
   0xc   :  { %108 = vmatpush.msra.mxu2 %v86_v15  ;;  %122 = vrot.lane.b32.xlu1 %v216_v2, %s220_s14 }
   0xd   :  { %143 = vmatpush.msra.mxu3 %v118_v25  ;;  %178 = vmatpush.msrb.mxu0 %v155_v33 }
   0xf   :  { %179 = vmatpush.msrb.mxu0 %v154_v34 }
  0x74   :  { %v54_v17 = vpop.permute.xlu0 %53 }
  0x76   :  { %v114_v27 = vpop.permute.xlu1 %113 }
  0x7e   :  { %v123_v35 = vpop.permute.xlu1 %122 }
  0x84   :  { %v41_v9 = vpop.f32.mrf.mxu0 }
  0x85   :  { %v47_v10 = vadd.f32 %v216_v2, %v41_v9  ;;  %81 = vrot.lane.b32.xlu0 %v41_v9, %s218_s24 }
  0x87   :  { %v48_v11 = vmax.f32 %v47_v10, 0.0 }
  0x89   :  { %209 = vmatmul.msk.f32.vlgmr.msra.gmra.mxu1 %vm56_vm1, %v48_v11 }
  0x8d   :  { %189 = vrot.lane.b32.xlu0 %v217_v26, %s219_s0 }
  0xf7   :  { %v82_v20 = vpop.permute.xlu0 %81 }
  0xff   :  { %v190_v43 = vpop.permute.xlu0 %189 }
 0x106   :  { %v77_v18 = vpop.f32.mrf.mxu1 }
 0x107   :  { %v78_v19 = vadd.f32 %v77_v18, %v54_v17 }
 0x109   :  { %v84_v21 = vadd.f32 %v82_v20, %v78_v19 }
 0x10b   :  { %v85_v22 = vmax.f32 %v84_v21, 0.0 }
 0x10d   :  { %210 = vmatmul.msk.f32.vlgmr.msra.gmra.mxu2 %vm56_vm1, %v85_v22 }
 0x190   :  { %v110_v28 = vpop.f32.mrf.mxu2 }
 0x191   :  { %v116_v29 = vadd.f32 %v114_v27, %v110_v28  ;;  %149 = vrot.lane.b32.xlu2 %v110_v28, %s218_s24 }
 0x193   :  { %v117_v30 = vmax.f32 %v116_v29, 0.0 }
 0x195   :  { %211 = vmatmul.msk.f32.vlgmr.msra.gmra.mxu3 %vm56_vm1, %v117_v30 }
 0x199   :  { %185 = vrot.lane.b32.xlu2 %v217_v26, %s218_s24 }
 0x1eb   :  { %v150_v38 = vpop.permute.xlu2 %149 }
 0x1f3   :  { %v186_v44 = vpop.permute.xlu2 %185 }
 0x218   :  { %v145_v36 = vpop.f32.mrf.mxu3 }
 0x219   :  { %v146_v37 = vadd.f32 %v145_v36, %v123_v35 }
 0x21b   :  { %v152_v39 = vadd.f32 %v150_v38, %v146_v37 }
 0x21d   :  { %v153_v40 = vmax.f32 %v152_v39, 0.0 }
 0x21f   :  { %212 = vmatmul.msk.f32.vlgmr.msrb.gmra.mxu0 %vm56_vm1, %v153_v40  ;;  %v192_v46 = vmul.f32 %v190_v43, %v153_v40 }
 0x29c   :  { %v181_v41 = vpop.f32.mrf.mxu0 }
 0x29d   :  { %v182_v42 = vadd.f32 %v217_v26, %v181_v41 }
 0x29f   :  { %v184_v45 = vmax.f32 %v182_v42, 0.0 }
 0x2a1   :  { %v188_v47 = vmul.f32 %v186_v44, %v184_v45 }
 0x2a3   :  { %v193_v48 = vadd.f32 %v192_v46, %v188_v47 }
 0x2a5   :  { %v194_v49 = vsel %vm56_vm1, %v193_v48, 0.0 }
 0x2a6   :  { %195 = vadd.xlane.f32.xlu1 %v194_v49 }
 0x319   :  { %v196_v50 = vpop.xlane.xlu1 %195 }
 0x31a   :  { %v197_v51 = vadd.f32 %v217_v26, %v196_v50 }
 0x31c   :  { %199 = vrot.lane.b32.xlu2 %v197_v51, %s220_s14 }
 0x376   :  { %v200_v52 = vpop.permute.xlu2 %199 }
 0x377   :  { %203 = vst.msk [vmem:[%s324_s3] sm:$0xff] %vm202_vm2, %v200_v52 }

</bundles_post_ra>
